<compile_context>
chip_gen: v7x
topology: tpu7x:2x2x1
jax: 0.10.0
libtpu: 0.0.40
codegen_flags: <defaults>
</compile_context>

<pallas_src>
import functools

import numpy as np
import jax
import jax.numpy as jnp
from jax.experimental import pallas as pl
from jax.experimental.pallas import tpu as pltpu

NEG_SLOPE = 0.1
_MIB = 1024 * 1024


# ----------------------------- Pallas kernel -------------------------------

def _attention_kernel(h_ref, w1_ref, b1_ref, w2_ref, b2_ref, o_ref, *,
                      compute_dtype):
    # h_ref: (TILE_M, D)   w*_ref: (D, D)   b*_ref: (1, D)
    y = jnp.dot(h_ref[...].astype(compute_dtype), w1_ref[...],
                preferred_element_type=jnp.float32)
    y = y + b1_ref[...]
    y = jnp.where(y > 0.0, y, NEG_SLOPE * y)                  # LeakyReLU(0.1)

    y = jnp.dot(y.astype(compute_dtype), w2_ref[...],
                preferred_element_type=jnp.float32)
    y = y + b2_ref[...]
    y = jnp.where(y > 0.0, y, NEG_SLOPE * y)                  # LeakyReLU(0.1)

    gate = jax.nn.sigmoid(y)                                  # sigmoid on EUP
    # Re-read h from VMEM only here (no f32 copy kept live across the matmuls).
    o_ref[...] = (h_ref[...].astype(jnp.float32) * gate).astype(o_ref.dtype)


# ------------------------- capability / sizing helpers ----------------------

def _round_up(x, m):
    return ((x + m - 1) // m) * m


def _vmem_plan():
    """(tile-picker budget, vmem_limit_bytes) sized per TPU generation."""
    try:
        cap = int(pltpu.get_tpu_info().vmem_capacity_bytes)
    except Exception:
        cap = 64 * _MIB                      # conservative default (v7x per-TC)
    if cap >= 96 * _MIB:                     # v5e / v6e: 128 MiB physical VMEM
        return 80 * _MIB, 100 * _MIB
    return 38 * _MIB, 50 * _MIB              # v7x: 64 MiB per TC, keep headroom


_SINGLE_BUFFER_WEIGHTS = None  # resolved (eagerly, outside jit) by the probe


def probe_single_buffering():
    """Check whether pipeline_mode=pl.Buffered(1) compiles/runs on this build.

    Must be called OUTSIDE jit (it executes a tiny kernel eagerly). If the
    probe fails for any reason we fall back to default double buffering.
    """
    global _SINGLE_BUFFER_WEIGHTS
    if _SINGLE_BUFFER_WEIGHTS is None:
        try:
            def _copy(x_ref, o_ref):
                o_ref[...] = x_ref[...]

            x = jnp.zeros((8, 128), jnp.float32)
            out = pl.pallas_call(
                _copy,
                out_shape=jax.ShapeDtypeStruct((8, 128), jnp.float32),
                grid=(2,),
                in_specs=[pl.BlockSpec((8, 128), lambda i: (0, 0),
                                       pipeline_mode=pl.Buffered(buffer_count=1))],
                out_specs=pl.BlockSpec((8, 128), lambda i: (0, 0)),
            )(x)
            jax.block_until_ready(out)
            _SINGLE_BUFFER_WEIGHTS = True
        except Exception:
            _SINGLE_BUFFER_WEIGHTS = False
    return _SINGLE_BUFFER_WEIGHTS


def _pick_tile_m(D, h_itemsize, compute_dtype, budget_bytes, single_buf_weights):
    """Largest row tile whose full working set fits the VMEM budget."""
    cb = jnp.dtype(compute_dtype).itemsize
    wbuf = 1 if single_buf_weights else 2
    weight_bytes = wbuf * (2 * D * D * cb + 2 * D * 4)
    if weight_bytes > budget_bytes // 2:
        # TODO(synk): when 2*D*D no longer fits VMEM, stream W1^T column tiles /
        # W2^T row tiles over an "arbitrary" hidden-dim grid axis with a
        # pl.when-initialized f32 accumulator instead of the resident-weight path.
        raise ValueError(
            f"input_size={D} too large for the resident-weight kernel "
            f"({weight_bytes} B of weights vs {budget_bytes} B VMEM budget)")
    for t in (1024, 512, 256, 128, 64, 32, 16, 8):
        stream = 2 * t * D * (h_itemsize + 4)   # h + out blocks, double buffered
        interm = 3 * t * D * 4                  # y / gate / f32 view of h block
        if weight_bytes + stream + interm <= budget_bytes:
            return t
    return 8


def _choose_row_tiling(M, max_tile):
    """Pick (tile_m, padded_M). Prefer a tile that avoids any row padding."""
    if M <= max_tile:
        return M, M                              # single full-dim block, no pad
    t = max_tile
    while t >= max(8, max_tile // 4):            # exact multiple-of-8 divisor
        if M % t == 0:
            return t, M
        t -= 8
    return max_tile, _round_up(M, max_tile)      # fall back to row padding


# ------------------------------- wrappers ------------------------------------

def prepare_params(params, compute_dtype=jnp.float32):
    """One-time host-side prep (do this once, not per call):
    PyTorch Linear computes y = x @ W^T + b with W of shape (out, in), so we
    store W^T (in, out) and cast to the MXU compute dtype; biases stay f32."""
    D = params["w1"].shape[0]
    return {
        "w1t": jnp.asarray(params["w1"]).T.astype(compute_dtype),
        "w2t": jnp.asarray(params["w2"]).T.astype(compute_dtype),
        "b1": jnp.asarray(params["b1"], jnp.float32).reshape(1, D),
        "b2": jnp.asarray(params["b2"], jnp.float32).reshape(1, D),
    }


def attention_forward(h, prepared, *, tile_m=None):
    """Fused  h * sigmoid(LReLU(LReLU(h @ W1^T + b1) @ W2^T + b2)).

    `prepared` comes from prepare_params(); bf16 weights give the MXU fast
    path on v5e/v6e/v7x while the epilogue stays f32.
    """
    orig_shape = h.shape
    D = orig_shape[-1]
    M = int(np.prod(orig_shape[:-1])) if len(orig_shape) > 1 else 1
    h2 = h.reshape(M, D)

    compute_dtype = jnp.dtype(prepared["w1t"].dtype)
    assert prepared["w1t"].shape == (D, D) and prepared["w2t"].shape == (D, D)

    single_buf = bool(_SINGLE_BUFFER_WEIGHTS)
    budget, vmem_limit = _vmem_plan()
    if tile_m is None:
        max_tile = _pick_tile_m(D, h2.dtype.itemsize, compute_dtype, budget,
                                single_buf)
        tile_m, Mp = _choose_row_tiling(M, max_tile)
    else:
        Mp = _round_up(M, tile_m)

    # Only pad rows when strictly necessary (avoids an HBM->HBM copy of the
    # whole activation); the feature dim is never padded.
    h_p = h2 if Mp == M else jnp.pad(h2, ((0, Mp - M), (0, 0)))

    grid = (Mp // tile_m,)
    cb = jnp.dtype(compute_dtype).itemsize
    cost = pl.CostEstimate(
        flops=2 * 2 * Mp * D * D,
        transcendentals=Mp * D,
        bytes_accessed=2 * Mp * D * h2.dtype.itemsize + 2 * D * D * cb + 2 * D * 4,
    )

    def weight_spec(shape):
        # Constant index_map => never re-fetched; single-buffer when supported
        # to halve the resident weight VMEM footprint.
        if single_buf:
            return pl.BlockSpec(shape, lambda i: (0, 0),
                                pipeline_mode=pl.Buffered(buffer_count=1))
        return pl.BlockSpec(shape, lambda i: (0, 0))

    h_spec = pl.BlockSpec((tile_m, D), lambda i: (i, 0))
    if single_buf and grid[0] >= 8 and tile_m <= 64:
        # Small per-step compute: deepen h buffering to hide the DMA.
        h_spec = pl.BlockSpec((tile_m, D), lambda i: (i, 0),
                              pipeline_mode=pl.Buffered(buffer_count=3))

    out = pl.pallas_call(
        functools.partial(_attention_kernel, compute_dtype=compute_dtype),
        out_shape=jax.ShapeDtypeStruct((Mp, D), h.dtype),
        grid=grid,
        in_specs=[
            h_spec,                      # h rows (streamed)
            weight_spec((D, D)),         # W1^T  (resident)
            weight_spec((1, D)),         # b1    (resident)
            weight_spec((D, D)),         # W2^T  (resident)
            weight_spec((1, D)),         # b2    (resident)
        ],
        out_specs=pl.BlockSpec((tile_m, D), lambda i: (i, 0)),
        compiler_params=pltpu.CompilerParams(
            dimension_semantics=("parallel",),
            vmem_limit_bytes=vmem_limit,
        ),
        cost_estimate=cost,
    )(h_p, prepared["w1t"], prepared["b1"], prepared["w2t"], prepared["b2"])

    if Mp != M:
        out = out[:M]
    return out.reshape(orig_shape)


# ------------------------- pure-JAX reference check -------------------------

def attention_reference(h, params):
    hp = jax.lax.Precision.HIGHEST
    y = jnp.dot(h, params["w1"].T, precision=hp) + params["b1"]
    y = jnp.where(y > 0.0, y, NEG_SLOPE * y)
    y = jnp.dot(y, params["w2"].T, precision=hp) + params["b2"]
    y = jnp.where(y > 0.0, y, NEG_SLOPE * y)
    return h * (1.0 / (1.0 + jnp.exp(-y)))


# ------------------------------ param init ----------------------------------

def init_params(key, input_size):
    """Match PyTorch nn.Linear default init: U(-1/sqrt(in), 1/sqrt(in))."""
    bound = 1.0 / np.sqrt(input_size)
    k1, k2, k3, k4 = jax.random.split(key, 4)
    return {
        "w1": jax.random.uniform(k1, (input_size, input_size), jnp.float32, -bound, bound),
        "b1": jax.random.uniform(k2, (input_size,), jnp.float32, -bound, bound),
        "w2": jax.random.uniform(k3, (input_size, input_size), jnp.float32, -bound, bound),
        "b2": jax.random.uniform(k4, (input_size,), jnp.float32, -bound, bound),
    }


if __name__ == "__main__":
    B, S, D = 2, 8, 32                           # batch=2, seq=8, hidden=32

    key = jax.random.PRNGKey(0)
    k_x, k_p = jax.random.split(key)
    h = jax.random.normal(k_x, (B, S, D), jnp.float32)
    params = init_params(k_p, D)

    ref = attention_reference(h, params)

    probe_single_buffering()                     # eager probe, outside jit

    fwd = jax.jit(attention_forward)

    # f32 path (exact-ish)
    prep_f32 = prepare_params(params, jnp.float32)
    out_f32 = jax.block_until_ready(fwd(h, prep_f32))
    assert out_f32.shape == (B, S, D), out_f32.shape
    np.testing.assert_allclose(np.asarray(out_f32), np.asarray(ref),
                               rtol=1e-3, atol=1e-3)

    # bf16 MXU path (valid on v5e/v6e/v7x: bf16 matmuls, f32 accumulate/epilogue)
    prep_bf16 = prepare_params(params, jnp.bfloat16)
    out_bf16 = jax.block_until_ready(fwd(h, prep_bf16))
    np.testing.assert_allclose(np.asarray(out_bf16), np.asarray(ref),
                               rtol=5e-2, atol=5e-2)

    print("KERNEL_OK")
</pallas_src>

<mosaic_0001>
module attributes {stable_mosaic.version = 11 : i64} {
  func.func @_copy(%arg0: i32, %arg1: memref<8x128xf32, #tpu.memory_space<vmem>>, %arg2: memref<8x128xf32, #tpu.memory_space<vmem>>) attributes {dimension_semantics = [#tpu.dimension_semantics<arbitrary>], iteration_bounds = array<i64: 2>, scalar_prefetch = 0 : i64, scratch_operands = 0 : i64, tpu.core_type = #tpu.core_type<tc>, window_params = [{pipeline_mode = #tpu.pipeline_mode<synchronous>, transform_indices = @transform_0, window_bounds = array<i64: 8, 128>}, {pipeline_mode = #tpu.pipeline_mode<synchronous>, transform_indices = @transform_1, window_bounds = array<i64: 8, 128>}]} {
    %c0 = arith.constant 0 : index
    %c0_0 = arith.constant 0 : index
    %0 = vector.load %arg1[%c0, %c0_0] : memref<8x128xf32, #tpu.memory_space<vmem>>, vector<8x128xf32>
    %c0_1 = arith.constant 0 : index
    %c0_2 = arith.constant 0 : index
    %1 = vector.load %arg2[%c0_1, %c0_2] : memref<8x128xf32, #tpu.memory_space<vmem>>, vector<8x128xf32>
    tpu.vector_store %arg2[%c0_1, %c0_2], %0 {strides = array<i32>} : memref<8x128xf32, #tpu.memory_space<vmem>>, vector<8x128xf32>,
    return
  }
  func.func @transform_0(%arg0: i32) -> (i32, i32) {
    %c0_i32 = arith.constant 0 : i32
    %c0_i32_0 = arith.constant 0 : i32
    %c0_i32_1 = arith.constant 0 : i32
    return %c0_i32, %c0_i32_0 : i32, i32
  }
  func.func @transform_1(%arg0: i32) -> (i32, i32) {
    %c0_i32 = arith.constant 0 : i32
    %c0_i32_0 = arith.constant 0 : i32
    %c0_i32_1 = arith.constant 0 : i32
    return %c0_i32, %c0_i32_0 : i32, i32
  }
}

module attributes {stable_mosaic.version = 11 : i64} {
  func.func @_attention_kernel(%arg0: i32, %arg1: memref<16x32xf32, #tpu.memory_space<vmem>>, %arg2: memref<32x32xf32, #tpu.memory_space<vmem>>, %arg3: memref<1x32xf32, #tpu.memory_space<vmem>>, %arg4: memref<32x32xf32, #tpu.memory_space<vmem>>, %arg5: memref<1x32xf32, #tpu.memory_space<vmem>>, %arg6: memref<16x32xf32, #tpu.memory_space<vmem>>) attributes {dimension_semantics = [#tpu.dimension_semantics<parallel>], iteration_bounds = array<i64: 1>, scalar_prefetch = 0 : i64, scratch_operands = 0 : i64, tpu.core_type = #tpu.core_type<tc>, window_params = [{transform_indices = @transform_0, window_bounds = array<i64: 16, 32>}, {pipeline_mode = #tpu.pipeline_mode<synchronous>, transform_indices = @transform_1, window_bounds = array<i64: 32, 32>}, {pipeline_mode = #tpu.pipeline_mode<synchronous>, transform_indices = @transform_2, window_bounds = array<i64: 1, 32>}, {pipeline_mode = #tpu.pipeline_mode<synchronous>, transform_indices = @transform_3, window_bounds = array<i64: 32, 32>}, {pipeline_mode = #tpu.pipeline_mode<synchronous>, transform_indices = @transform_4, window_bounds = array<i64: 1, 32>}, {transform_indices = @transform_5, window_bounds = array<i64: 16, 32>}]} {
    %c0 = arith.constant 0 : index
    %c0_0 = arith.constant 0 : index
    %0 = vector.load %arg1[%c0, %c0_0] : memref<16x32xf32, #tpu.memory_space<vmem>>, vector<16x32xf32>
    %c0_1 = arith.constant 0 : index
    %c0_2 = arith.constant 0 : index
    %1 = vector.load %arg2[%c0_1, %c0_2] : memref<32x32xf32, #tpu.memory_space<vmem>>, vector<32x32xf32>
    %cst = arith.constant dense<0.000000e+00> : vector<16x32xf32>
    %2 = tpu.matmul %0, %1, %cst {dimension_numbers = #tpu.dot_dimension_numbers<[1], [0], [0], [1], [0, 0, 1, 1], [], []>} : vector<16x32xf32>, vector<32x32xf32>, vector<16x32xf32> -> vector<16x32xf32>
    %c0_3 = arith.constant 0 : index
    %c0_4 = arith.constant 0 : index
    %3 = vector.load %arg3[%c0_3, %c0_4] : memref<1x32xf32, #tpu.memory_space<vmem>>, vector<1x32xf32>
    %4 = vector.broadcast %3 : vector<1x32xf32> to vector<16x32xf32>
    %5 = arith.addf %2, %4 : vector<16x32xf32>
    %cst_5 = arith.constant 0.000000e+00 : f32
    %6 = vector.broadcast %cst_5 : f32 to vector<16x32xf32>
    %7 = arith.cmpf ogt, %5, %6 : vector<16x32xf32>
    %cst_6 = arith.constant 1.000000e-01 : f32
    %8 = vector.broadcast %cst_6 : f32 to vector<16x32xf32>
    %9 = arith.mulf %8, %5 : vector<16x32xf32>
    %10 = arith.select %7, %5, %9 : vector<16x32xi1>, vector<16x32xf32>
    %c0_7 = arith.constant 0 : index
    %c0_8 = arith.constant 0 : index
    %11 = vector.load %arg4[%c0_7, %c0_8] : memref<32x32xf32, #tpu.memory_space<vmem>>, vector<32x32xf32>
    %cst_9 = arith.constant dense<0.000000e+00> : vector<16x32xf32>
    %12 = tpu.matmul %10, %11, %cst_9 {dimension_numbers = #tpu.dot_dimension_numbers<[1], [0], [0], [1], [0, 0, 1, 1], [], []>} : vector<16x32xf32>, vector<32x32xf32>, vector<16x32xf32> -> vector<16x32xf32>
    %c0_10 = arith.constant 0 : index
    %c0_11 = arith.constant 0 : index
    %13 = vector.load %arg5[%c0_10, %c0_11] : memref<1x32xf32, #tpu.memory_space<vmem>>, vector<1x32xf32>
    %14 = vector.broadcast %13 : vector<1x32xf32> to vector<16x32xf32>
    %15 = arith.addf %12, %14 : vector<16x32xf32>
    %cst_12 = arith.constant 0.000000e+00 : f32
    %16 = vector.broadcast %cst_12 : f32 to vector<16x32xf32>
    %17 = arith.cmpf ogt, %15, %16 : vector<16x32xf32>
    %cst_13 = arith.constant 1.000000e-01 : f32
    %18 = vector.broadcast %cst_13 : f32 to vector<16x32xf32>
    %19 = arith.mulf %18, %15 : vector<16x32xf32>
    %20 = arith.select %17, %15, %19 : vector<16x32xi1>, vector<16x32xf32>
    %21 = arith.negf %20 : vector<16x32xf32>
    %22 = math.exp %21 : vector<16x32xf32>
    %cst_14 = arith.constant 1.000000e+00 : f32
    %23 = vector.broadcast %cst_14 : f32 to vector<16x32xf32>
    %24 = arith.addf %23, %22 : vector<16x32xf32>
    %25 = arith.divf %23, %24 : vector<16x32xf32>
    %c0_15 = arith.constant 0 : index
    %c0_16 = arith.constant 0 : index
    %26 = vector.load %arg1[%c0_15, %c0_16] : memref<16x32xf32, #tpu.memory_space<vmem>>, vector<16x32xf32>
    %27 = arith.mulf %26, %25 : vector<16x32xf32>
    %c0_17 = arith.constant 0 : index
    %c0_18 = arith.constant 0 : index
    %28 = vector.load %arg6[%c0_17, %c0_18] : memref<16x32xf32, #tpu.memory_space<vmem>>, vector<16x32xf32>
    tpu.vector_store %arg6[%c0_17, %c0_18], %27 {strides = array<i32>} : memref<16x32xf32, #tpu.memory_space<vmem>>, vector<16x32xf32>,
    return
  }
  func.func @transform_0(%arg0: i32) -> (i32, i32) {
    %c0_i32 = arith.constant 0 : i32
    %c0_i32_0 = arith.constant 0 : i32
    return %arg0, %c0_i32 : i32, i32
  }
  func.func @transform_1(%arg0: i32) -> (i32, i32) {
    %c0_i32 = arith.constant 0 : i32
    %c0_i32_0 = arith.constant 0 : i32
    %c0_i32_1 = arith.constant 0 : i32
    return %c0_i32, %c0_i32_0 : i32, i32
  }
  func.func @transform_2(%arg0: i32) -> (i32, i32) {
    %c0_i32 = arith.constant 0 : i32
    %c0_i32_0 = arith.constant 0 : i32
    %c0_i32_1 = arith.constant 0 : i32
    return %c0_i32, %c0_i32_0 : i32, i32
  }
  func.func @transform_3(%arg0: i32) -> (i32, i32) {
    %c0_i32 = arith.constant 0 : i32
    %c0_i32_0 = arith.constant 0 : i32
    %c0_i32_1 = arith.constant 0 : i32
    return %c0_i32, %c0_i32_0 : i32, i32
  }
  func.func @transform_4(%arg0: i32) -> (i32, i32) {
    %c0_i32 = arith.constant 0 : i32
    %c0_i32_0 = arith.constant 0 : i32
    %c0_i32_1 = arith.constant 0 : i32
    return %c0_i32, %c0_i32_0 : i32, i32
  }
  func.func @transform_5(%arg0: i32) -> (i32, i32) {
    %c0_i32 = arith.constant 0 : i32
    %c0_i32_0 = arith.constant 0 : i32
    return %arg0, %c0_i32 : i32, i32
  }
}

</mosaic_0001>

<bundles_post_ra>
// kernel: tpu_custom_call.1
= control target key start
LH: loop header
LB: loop body
LE: loop exit
PB: predicated region body
PF: predicated region fallthrough
CT: control target
= control target key end

     0   :  { %6 = vsyncpa [#allocation3], 0  ;;  %s340_s0 = inlined_call_operand.hbm [shape: f32[8,128], index: 0, kind: input, shape index: {}]   ;;  %s341_s1 = inlined_call_operand.hbm [shape: f32[8,128], index: 1, kind: output, shape index: {}]  }
   0x1   :  { %7 = vsyncpa [#allocation4], 0  ;;  %s261_s6 = smov 0  }
   0x2 LB: > { %s144_s7 = sadd.s32 4294967295, %s247_s6   ;;  %p145_p0 = scmp.ge.s32.totalorder %s247_s6, 1  ;;  %s247_s6 = sphi %s261_s6, %s13_s6  }
   0x3   : > { %p60_p1 = scmp.lt.s32.totalorder %s247_s6, 3  ;;  %p275_p3 = scmp.eq.s32.totalorder %s144_s7, 0 }
   0x4   : > { %s249_s10 = smov [#allocation2]   ;;  %s179_s15 = scalar_lea.hbm %s340_s0, 128 }
   0x5   : > { %p269_p2 = pnand %p145_p0, %p60_p1  ;;  %s73_s11 = sshll.u32 %s249_s10, 4  ;;  %s74_s11 = int_to_ptr.vmem [resolvable:$true] %s73_s11 }
   0x6   : > { %s346_s9 = scalar_select %p275_p3, 1, 0 }
   0x7   : > { %s345_s8 = scalar_select %p269_p2, 1, 0 }
   0x8   : > { %p161_p4 = pneg %p269_p2  ;;  %p180_p6 = scmp.ne.s32.totalorder %s340_s0, %s179_s15 }
   0x9   : > { %p186_p10 = scmp.lt.u32.totalorder %s179_s15, %s340_s0 }
   0xa   : > { %p283_p5 = pnand %p275_p3, %p161_p4 }
   0xc   : > { %p181_p7 = pneg %p283_p5 }
   0xe   : > { %p182_p8 = pnand %p181_p7, %p180_p6 }
  0x10   : > { %p183_p9 = pneg %p182_p8 }
  0x12   : > { %p188_p11 = pnand %p186_p10, %p183_p9 }
  0x14   : > { %191 = shalt.err (!%p188_p11)
}
  0x15   : > { %s192_s20 = scalar_lea.vmem %s74_s11, 128  ;;  %p200_p1 = scmp.lt.s32.totalorder %s74_s11, %s74_s11 }
  0x16   : > { %p193_p12 = scmp.ne.s32.totalorder %s74_s11, %s192_s20  ;;  %p201_p4 = scmp.lt.s32.totalorder %s192_s20, %s192_s20 }
  0x18   : > { %p195_p13 = pnand %p193_p12, %p181_p7  ;;  %p202_p3 = por %p201_p4, %p200_p1 }
  0x1a   : > { %p196_p0 = pneg %p195_p13 }
  0x1c   : > { %p203_p2 = pnand %p202_p3, %p196_p0 }
  0x1e   : > { %206 = shalt.err (!%p203_p2)
}
  0x1f   : > { %164 = dma.hbm_to_vmem [thread:$0]  (!%p283_p5), %s340_s0, 128, %s74_s11, [#allocation3]  }
  0x20   : > { %p348_p6 = scmp.ne.s32.totalorder %s345_s8, 0 }
  0x21   : > { %p349_p8 = scmp.ne.s32.totalorder (!%p348_p6), %s346_s9, 0 }
  0x22   : > { %86 = sbr.rel (%p348_p6) target bundleno = 67 (0x43), region = 24 }
  0x29   : > { %238 = dma.done.wait (%p349_p8), [#allocation3], 128  }
  0x2a   : > { %240 = vsyncadd (%p349_p8), [#allocation3], 4294967168  ;;  %s250_s23 = smov [#allocation5]   ;;  %p311_p2 = scmp.eq.s32.totalorder %s144_s7, 1  ;;  %v96_v0 = vld [vmem:[#allocation2] sm:$0xff] }
  0x2b   : > { %s105_s24 = sshll.u32 %s250_s23, 4  ;;  %97 = vst [vmem:[#allocation5] sm:$0xff] %v96_v0  ;;  %s106_s24 = int_to_ptr.vmem [resolvable:$true] %s105_s24 }
  0x2c   : > { %s207_s26 = scalar_lea.vmem %s106_s24, 128  ;;  %p214_p9 = scmp.lt.s32.totalorder %s106_s24, %s106_s24 }
  0x2d   : > { %p208_p3 = scmp.ne.s32.totalorder %s106_s24, %s207_s26  ;;  %p215_p10 = scmp.lt.s32.totalorder %s207_s26, %s207_s26 }
  0x2f   : > { %p209_p5 = pnand %p208_p3, %p311_p2  ;;  %p216_p11 = por %p215_p10, %p214_p9 }
  0x31   : > { %p210_p7 = pneg %p209_p5 }
  0x33   : > { %p217_p12 = pnand %p216_p11, %p210_p7 }
  0x35   : > { %220 = shalt.err (!%p217_p12)
}
  0x36   : > { %s221_s29 = scalar_lea.hbm %s341_s1, 128 }
  0x37   : > { %p222_p13 = scmp.ne.s32.totalorder %s341_s1, %s221_s29  ;;  %p227_p4 = scmp.lt.u32.totalorder %s221_s29, %s341_s1 }
  0x39   : > { %p223_p0 = pnand %p222_p13, %p311_p2 }
  0x3b   : > { %p224_p1 = pneg %p223_p0 }
  0x3d   : > { %p229_p6 = pnand %p227_p4, %p224_p1 }
  0x3f   : > { %232 = shalt.err (!%p229_p6)
}
  0x40   : > { %158 = dma.vmem_to_hbm [thread:$0]  (%p311_p2), %s106_s24, 128, %s341_s1, [#allocation4]  }
  0x41   : > { %242 = dma.done.wait (%p311_p2), [#allocation4], 128  }
  0x42   : > { %244 = vsyncadd (%p311_p2), [#allocation4], 4294967168 }
  0x43 PF: > { %s13_s6 = sadd.s32 1, %s247_s6  }
  0x44   : > { %p10_p8 = scmp.ge.s32.totalorder %s13_s6, 4  }
  0x46   :  { %12 = sbr.rel (!%p10_p8) target bundleno = 2 (0x2), region = 53 }
  0x4d   :  { %118 = vsyncpa [#allocation3], 1 }
  0x4e   :  { %120 = vsyncpa [#allocation3 + $0x1], 1 }
  0x4f   :  { %121 = vsyncpa [#allocation4], 1 }
  0x50   :  { %123 = vsyncpa [#allocation4 + $0x1], 1 }

// kernel: attention_forward.1
= control target key start
LH: loop header
LB: loop body
LE: loop exit
PB: predicated region body
PF: predicated region fallthrough
CT: control target
= control target key end

     0   :  { %10 = vsyncpa [#allocation3], 0  ;;  %s576_s0 = inlined_call_operand.hbm [shape: f32[16,32], index: 0, kind: input, shape index: {}]   ;;  %s577_s1 = inlined_call_operand.hbm [shape: f32[32,32], index: 1, kind: input, shape index: {}]   ;;  %s578_s2 = inlined_call_operand.vmem [shape: f32[1,32], index: 2, kind: input, shape index: {}]   ;;  %s579_s3 = inlined_call_operand.hbm [shape: f32[32,32], index: 3, kind: input, shape index: {}]   ;;  %s580_s4 = inlined_call_operand.vmem [shape: f32[1,32], index: 4, kind: input, shape index: {}]   ;;  %s581_s5 = inlined_call_operand.hbm [shape: f32[16,32], index: 5, kind: output, shape index: {}]  }
   0x1   :  { %11 = vsyncpa [#allocation6], 0 }
   0x2   :  { %12 = vsyncpa [#allocation4], 0  ;;  %s461_s18 = smov [#allocation5]   ;;  %s462_s20 = smov [#allocation2]  }
   0x3   :  { %s30_s19 = sshll.u32 %s461_s18, 4  ;;  %s18_s21 = sshll.u32 %s462_s20, 4  ;;  %s31_s19 = int_to_ptr.vmem [resolvable:$true] %s30_s19  ;;  %s497_s21 = int_to_ptr.vmem [resolvable:$true] %s18_s21 }
   0x4   :  { %s367_s24 = scalar_lea.hbm %s577_s1, 512 }
   0x5   :  { %p368_p0 = scmp.ne.s32.totalorder %s577_s1, %s367_s24  ;;  %p371_p1 = scmp.lt.u32.totalorder %s367_s24, %s577_s1 }
   0x7   :  { %p373_p2 = pnand %p371_p1, %p368_p0 }
   0x9   :  { %376 = shalt.err (!%p373_p2)
}
   0xa   :  { %s377_s29 = scalar_lea.vmem %s31_s19, 512  ;;  %p382_p4 = scmp.lt.s32.totalorder %s31_s19, %s31_s19 }
   0xb   :  { %p378_p3 = scmp.ne.s32.totalorder %s31_s19, %s377_s29  ;;  %p383_p5 = scmp.lt.s32.totalorder %s377_s29, %s377_s29 }
   0xd   :  { %p384_p6 = por %p383_p5, %p382_p4 }
   0xf   :  { %p385_p7 = pnand %p384_p6, %p378_p3 }
  0x11   :  { %388 = shalt.err (!%p385_p7)
}
  0x12   :  { %s463_s30 = smov 128   ;;  %s464_s6 = smov 8  }
  0x13   :  { %36 = dma.hbm_to_vmem [thread:$0]  %s577_s1, 512, %s31_s19, [#allocation6], %s463_s30, %s463_s30, %s464_s6  }
  0x14   :  { %s389_s11 = scalar_lea.hbm %s576_s0, 256 }
  0x15   :  { %p390_p8 = scmp.ne.s32.totalorder %s576_s0, %s389_s11  ;;  %p393_p9 = scmp.lt.u32.totalorder %s389_s11, %s576_s0 }
  0x17   :  { %p395_p10 = pnand %p393_p9, %p390_p8 }
  0x19   :  { %398 = shalt.err (!%p395_p10)
}
  0x1a   :  { %s399_s16 = scalar_lea.vmem %s497_s21, 256  ;;  %p404_p12 = scmp.lt.s32.totalorder %s497_s21, %s497_s21 }
  0x1b   :  { %p400_p11 = scmp.ne.s32.totalorder %s497_s21, %s399_s16  ;;  %p405_p13 = scmp.lt.s32.totalorder %s399_s16, %s399_s16 }
  0x1d   :  { %p406_p0 = por %p405_p13, %p404_p12 }
  0x1f   :  { %p407_p1 = pnand %p406_p0, %p400_p11 }
  0x21   :  { %410 = shalt.err (!%p407_p1)
}
  0x22   :  { %24 = dma.hbm_to_vmem [thread:$0]  %s576_s0, 256, %s497_s21, [#allocation3], %s463_s30, %s463_s30, %s464_s6  }
  0x23   :  { %s465_s18 = smov [#allocation7]   ;;  %s411_s23 = scalar_lea.hbm %s579_s3, 512 }
  0x24   :  { %s44_s19 = sshll.u32 %s465_s18, 4  ;;  %p412_p2 = scmp.ne.s32.totalorder %s579_s3, %s411_s23  ;;  %s45_s19 = int_to_ptr.vmem [resolvable:$true] %s44_s19 }
  0x25   :  { %p415_p3 = scmp.lt.u32.totalorder %s411_s23, %s579_s3 }
  0x27   :  { %p417_p4 = pnand %p415_p3, %p412_p2 }
  0x29   :  { %420 = shalt.err (!%p417_p4)
}
  0x2a   :  { %s421_s28 = scalar_lea.vmem %s45_s19, 512  ;;  %p426_p6 = scmp.lt.s32.totalorder %s45_s19, %s45_s19 }
  0x2b   :  { %p422_p5 = scmp.ne.s32.totalorder %s45_s19, %s421_s28  ;;  %p427_p7 = scmp.lt.s32.totalorder %s421_s28, %s421_s28 }
  0x2d   :  { %p428_p8 = por %p427_p7, %p426_p6 }
  0x2f   :  { %p429_p9 = pnand %p428_p8, %p422_p5 }
  0x31   :  { %432 = shalt.err (!%p429_p9)
}
  0x32   :  { %50 = dma.hbm_to_vmem [thread:$0]  %s579_s3, 512, %s45_s19, [#allocation6], %s463_s30, %s463_s30, %s464_s6  }
  0x33   :  { %455 = dma.done.wait [#allocation3], 256  }
  0x34   :  { %456 = vsyncadd [#allocation3], 4294967040 }
  0x35   :  { %457 = dma.done.wait [#allocation6], 1024  }
  0x36   :  { %458 = vsyncadd [#allocation6], 4294966272  ;;  %vm75_vm0 = vcmask 261120   ;;  %v64_v0 = vld [vmem:[#allocation5] sm:$0xff]  ;;  %v65_v1 = vld [vmem:[#allocation5 + $0x8] sm:$0xff] }
  0x37   :  { %v66_v2 = vld [vmem:[#allocation5 + $0x10] sm:$0xff]  ;;  %v337_v3 = vpack.c.bf16 %v65_v1, %v64_v0  ;;  %v67_v4 = vld [vmem:[#allocation5 + $0x18] sm:$0xff]  ;;  %v163_v8 = vld [vmem:[#allocation7] sm:$0xff] }
  0x38   :  { %v62_v5 = vld [vmem:[#allocation2] sm:$0xff]  ;;  %v341_v6 = vpack.c.bf16 %v67_v4, %v66_v2  ;;  %v63_v7 = vld [vmem:[#allocation2 + $0x8] sm:$0xff]  ;;  %v164_v9 = vld [vmem:[#allocation7 + $0x8] sm:$0xff] }
  0x39   :  { %323 = vmatprep.mubr.msk.f32.mxu0 %vm75_vm0, %v62_v5  ;;  %338 = vmatprep.subr.bf16.mxu0 %v337_v3  ;;  %v345_v10 = vpack.c.bf16 %v164_v9, %v163_v8  ;;  %v165_v11 = vld [vmem:[#allocation7 + $0x10] sm:$0xff]  ;;  %v166_v12 = vld [vmem:[#allocation7 + $0x18] sm:$0xff] }
  0x3a   :  { %340 = vmatpush3.bf16.msra.mxu0 %v337_v3  ;;  %v349_v13 = vpack.c.bf16 %v166_v12, %v165_v11  ;;  %v295_v14 = vld [vmem:[%s578_s2] ss:$0 sm:$0xff]  ;;  %s466_s2 = smov [#allocation8]  }
  0x3b   :  { %342 = vmatprep.subr.bf16.mxu0 %v341_v6  ;;  %346 = vmatprep.subr.bf16.mxu1 %v345_v10  ;;  %v298_v23 = vld [vmem:[%s580_s4] ss:$0 sm:$0xff]  ;;  %s282_s4 = sshll.u32 %s466_s2, 4  ;;  %s283_s4 = int_to_ptr.vmem [resolvable:$true] %s282_s4 }
  0x3c   :  { %348 = vmatpush3.bf16.msra.mxu1 %v345_v10  ;;  %s433_s9 = scalar_lea.vmem %s283_s4, 256  ;;  %p438_p11 = scmp.lt.s32.totalorder %s283_s4, %s283_s4 }
  0x3d   :  { %350 = vmatprep.subr.bf16.mxu1 %v349_v13  ;;  %p434_p10 = scmp.ne.s32.totalorder %s283_s4, %s433_s9  ;;  %p439_p12 = scmp.lt.s32.totalorder %s433_s9, %s433_s9 }
  0x3e   :  { %344 = vmatpush3.bf16.msra.mxu0 %v341_v6 }
  0x3f   :  { %p440_p13 = por %p439_p12, %p438_p11 }
  0x40   :  { %352 = vmatpush3.bf16.msra.mxu1 %v349_v13 }
  0x41   :  { %324 = vmatmul.mubr.msk.f32.vlgmr.msra.gmra.mrb[0].mxu0 %vm75_vm0, %v63_v7  ;;  %p441_p0 = pnand %p440_p13, %p434_p10 }
 0x114   :  { %v325_v15 = vpop.f32.mrb[0].mxu0 }
 0x115   :  { %v154_v16 = vadd.f32 %v325_v15, %v295_v14  ;;  %v148_v17 = vpop.f32.mrb[1].mxu0 }
 0x116   :  { %v149_v18 = vadd.f32 %v295_v14, %v148_v17 }
 0x117   :  { %v160_v19 = vmul.f32 0.1, %v154_v16  ;;  %vm158_vm1 = vcmp.gt.f32.partialorder %v154_v16, 0.0 }
 0x118   :  { %vm157_vm2 = vcmp.gt.f32.partialorder %v149_v18, 0.0  ;;  %v159_v20 = vmul.f32 0.1, %v149_v18 }
 0x119   :  { %v162_v22 = vsel %vm158_vm1, %v154_v16, %v160_v19 }
 0x11a   :  { %v161_v21 = vsel %vm157_vm2, %v149_v18, %v159_v20 }
 0x11b   :  { %334 = vmatprep.mubr.msk.f32.mxu1 %vm75_vm0, %v161_v21 }
 0x11c   :  { %335 = vmatmul.mubr.msk.f32.vlgmr.msra.gmra.mrb[0].mxu1 %vm75_vm0, %v162_v22 }
 0x1ef   :  { %v336_v24 = vpop.f32.mrb[0].mxu1 }
 0x1f0   :  { %v252_v25 = vadd.f32 %v336_v24, %v298_v23  ;;  %v246_v26 = vpop.f32.mrb[1].mxu1 }
 0x1f1   :  { %v247_v27 = vadd.f32 %v298_v23, %v246_v26 }
 0x1f2   :  { %vm256_vm3 = vcmp.gt.f32.partialorder %v252_v25, 0.0  ;;  %v258_v28 = vmul.f32 0.1, %v252_v25 }
 0x1f3   :  { %vm255_vm4 = vcmp.gt.f32.partialorder %v247_v27, 0.0  ;;  %v257_v29 = vmul.f32 0.1, %v247_v27 }
 0x1f4   :  { %v260_v30 = vsel %vm256_vm3, %v252_v25, %v258_v28 }
 0x1f5   :  { %v302_v31 = vmul.f32 -1.442695, %v260_v30  ;;  %v259_v32 = vsel %vm255_vm4, %v247_v27, %v257_v29 }
 0x1f6   :  { %v301_v33 = vmul.f32 -1.442695, %v259_v32 }
 0x1f7   :  { %359 = vpow2.f32 %v302_v31 }
 0x1f8   :  { %361 = vpow2.f32 %v301_v33 }
 0x201   :  { %v360_v34 = vpop.eup %359 }
 0x202   :  { %v362_v35 = vpop.eup %361  ;;  %v268_v36 = vadd.f32 1.0, %v360_v34 }
 0x203   :  { %v267_v37 = vadd.f32 1.0, %v362_v35 }
 0x204   :  { %363 = vrcp.f32 %v268_v36 }
 0x205   :  { %365 = vrcp.f32 %v267_v37 }
 0x20e   :  { %v364_v38 = vpop.eup %363 }
 0x20f   :  { %v366_v39 = vpop.eup %365  ;;  %v274_v40 = vmul.f32 %v364_v38, %v63_v7 }
 0x210   :  { %v273_v41 = vmul.f32 %v366_v39, %v62_v5 }
 0x211   :  { %276 = vst.msk [vmem:[#allocation8 + $0x8] sm:$0xff] %vm75_vm0, %v274_v40 }
 0x212   :  { %275 = vst.msk [vmem:[#allocation8] sm:$0xff] %vm75_vm0, %v273_v41 }
 0x213   :  { %444 = shalt.err (!%p441_p0)
}
 0x214   :  { %s445_s12 = scalar_lea.hbm %s581_s5, 256 }
 0x215   :  { %p446_p1 = scmp.ne.s32.totalorder %s581_s5, %s445_s12  ;;  %p449_p2 = scmp.lt.u32.totalorder %s445_s12, %s581_s5 }
 0x217   :  { %p451_p3 = pnand %p449_p2, %p446_p1 }
 0x219   :  { %454 = shalt.err (!%p451_p3)
}
 0x21a   :  { %288 = dma.vmem_to_hbm [thread:$0]  %s283_s4, 256, %s581_s5, [#allocation4], %s463_s30, %s463_s30, %s464_s6  }
 0x21b   :  { %459 = dma.done.wait [#allocation4], 256  }
 0x21c   :  { %460 = vsyncadd [#allocation4], 4294967040 }
 0x21d   :  { %292 = vsyncpa [#allocation3], 1 }
 0x21e   :  { %293 = vsyncpa [#allocation6], 1 }
 0x21f   :  { %294 = vsyncpa [#allocation4], 1 }

</bundles_post_ra>
